<compile_context>
chip_gen: v7x
topology: tpu7x:2x2x1
jax: 0.10.0
libtpu: 0.0.40
codegen_flags: <defaults>
</compile_context>

<pallas_src>
import jax
import jax.numpy as jnp
import numpy as np
from jax.experimental import pallas as pl
from jax.experimental.pallas import tpu as pltpu


def _bilinear_up2_matrix(n_in: int) -> np.ndarray:
    """(2*n_in, n_in) matrix implementing 1-D bilinear upsample x2, align_corners=False."""
    n_out = 2 * n_in
    o = np.arange(n_out)
    coord = (o + 0.5) / 2.0 - 0.5
    i0 = np.floor(coord)
    frac = coord - i0
    i0c = np.clip(i0, 0, n_in - 1).astype(np.int32)
    i1c = np.clip(i0 + 1, 0, n_in - 1).astype(np.int32)
    m = np.zeros((n_out, n_in), dtype=np.float32)
    m[o, i0c] += (1.0 - frac).astype(np.float32)
    m[o, i1c] += frac.astype(np.float32)
    return m


def _skip_upsample_kernel(w_ref, uh_ref, uwt_ref, x_ref, y_ref, o_ref):
    # w_ref  : SMEM (Cout*Cin,)        flattened 1x1 conv weight (no bias)
    # uh_ref : VMEM (2H, H)            H-axis bilinear-x2 interpolation matrix
    # uwt_ref: VMEM (W, 2W)            transposed W-axis bilinear-x2 interpolation matrix
    # x_ref  : VMEM (1, Cin*H, W)      low-res input, one batch element (channels stacked on sublanes)
    # y_ref  : VMEM (1, Cout, 2H, 2W)  skip tensor, one batch element (NCHW slab)
    # o_ref  : VMEM (1, Cout, 2H, 2W)  output slab (aliases y's HBM buffer)
    cout, h2, w2 = o_ref.shape[1], o_ref.shape[2], o_ref.shape[3]
    h = h2 // 2
    cin = x_ref.shape[1] // h

    # --- W-axis bilinear x2, batched over ALL Cin channels: (Cin*H, W) @ (W, 2W) ---
    xw = jnp.dot(x_ref[0].astype(jnp.float32), uwt_ref[...],
                 preferred_element_type=jnp.float32)                     # (Cin*H, 2W)

    # --- 1x1 conv (no bias): tiny channel mix as scalar-weight VPU FMAs (weights in SMEM) ---
    # Exact reordering: the 1x1 conv and the bilinear upsample are both linear, so they commute.
    mixed = []
    for co in range(cout):
        acc = w_ref[co * cin] * xw[0:h, :]
        for ci in range(1, cin):
            acc = acc + w_ref[co * cin + ci] * xw[ci * h:(ci + 1) * h, :]
        mixed.append(acc)                                                # each (H, 2W)

    # --- H-axis bilinear x2, batched over the Cout maps along the lane axis ---
    xcat = jnp.concatenate(mixed, axis=-1)                               # (H, Cout*2W)
    up = jnp.dot(uh_ref[...], xcat, preferred_element_type=jnp.float32)  # (2H, Cout*2W)

    # --- skip add + store (static lane slices per output channel) ---
    for co in range(cout):
        o_ref[0, co] = (up[:, co * w2:(co + 1) * w2]
                        + y_ref[0, co].astype(jnp.float32)).astype(o_ref.dtype)


def _vmem_limit_bytes() -> int:
    """Per-generation VMEM budget: ~5/8 of physical capacity, capped at 96 MiB."""
    try:
        cap = pltpu.get_tpu_info().vmem_capacity_bytes
    except Exception:
        cap = 64 * 1024 * 1024  # conservative (v7x-sized) fallback
    return int(min(cap * 5 // 8, 96 * 1024 * 1024))


def skip_upsample(x_nchw: jnp.ndarray, y_nchw: jnp.ndarray,
                  conv_weight: jnp.ndarray) -> jnp.ndarray:
    """x_nchw: (N, Cin, H, W); y_nchw: (N, Cout, 2H, 2W); conv_weight: (Cout, Cin, 1, 1).

    NOTE: y_nchw's buffer is donated (input_output_aliases) and accumulated into — callers
    must not reuse `y_nchw` after this call.
    """
    N, Cin, H, W = x_nchw.shape
    Ny, Cout, H2, W2 = y_nchw.shape
    assert Ny == N and H2 == 2 * H and W2 == 2 * W
    assert conv_weight.shape == (Cout, Cin, 1, 1)

    w = jnp.asarray(conv_weight[:, :, 0, 0], dtype=jnp.float32).reshape(Cout * Cin)  # 1-D SMEM
    uh = jnp.asarray(_bilinear_up2_matrix(H))       # (2H, H)
    uwt = jnp.asarray(_bilinear_up2_matrix(W).T)    # (W, 2W)
    x_r = x_nchw.reshape(N, Cin * H, W)             # contiguous view (free): channels on sublanes

    # TODO(synk): for very large H/W, tile the H2 axis (1-row halo on x) and replace the dense
    # UH/UW^T matrices with a 2-tap pltpu.roll + 0.25/0.75 lerp so per-step VMEM stays bounded
    # on v7x (64 MiB physical); not needed at these sizes.
    return pl.pallas_call(
        _skip_upsample_kernel,
        out_shape=jax.ShapeDtypeStruct((N, Cout, H2, W2), y_nchw.dtype),
        grid=(N,),
        in_specs=[
            pl.BlockSpec(memory_space=pltpu.MemorySpace.SMEM),          # w   (scalars)
            pl.BlockSpec((H2, H), lambda n: (0, 0)),                    # uh  (grid-invariant)
            pl.BlockSpec((W, W2), lambda n: (0, 0)),                    # uwt (grid-invariant)
            pl.BlockSpec((1, Cin * H, W), lambda n: (n, 0, 0)),         # x   (one slab per batch)
            pl.BlockSpec((1, Cout, H2, W2), lambda n: (n, 0, 0, 0)),    # y   (contiguous slab)
        ],
        out_specs=pl.BlockSpec((1, Cout, H2, W2), lambda n: (n, 0, 0, 0)),
        input_output_aliases={4: 0},   # accumulate conv+upsample into y's buffer (y is donated)
        compiler_params=pltpu.CompilerParams(
            dimension_semantics=("parallel",),      # batch axis shards across v7x's 2 TCs
            vmem_limit_bytes=_vmem_limit_bytes()),
    )(w, uh, uwt, x_r, y_nchw)


def _reference(x_nchw, y_nchw, conv_weight):
    """Plain-JAX reference: bilinear x2 (half-pixel) -> 1x1 conv -> add."""
    N, Cin, H, W = x_nchw.shape
    up = jax.image.resize(x_nchw, (N, Cin, 2 * H, 2 * W), method="bilinear")
    w = conv_weight[:, :, 0, 0]                     # (Cout, Cin)
    conv = jnp.einsum('oc,nchw->nohw', w, up)
    return conv + y_nchw


if __name__ == "__main__":
    # Module hyper-params (consistent with SkipUpSample(in_channels, s_factor))
    in_channels, s_factor = 4, 2
    N, H, W = 2, 16, 16
    Cin = in_channels + s_factor
    Cout = in_channels

    key = jax.random.PRNGKey(0)
    kx, ky, kw = jax.random.split(key, 3)
    x = jax.random.normal(kx, (N, Cin, H, W), dtype=jnp.float32)           # upsample-branch input
    y = jax.random.normal(ky, (N, Cout, 2 * H, 2 * W), dtype=jnp.float32)  # skip connection
    # Deterministic conv weight (kaiming-like scale), shape (Cout, Cin, 1, 1), no bias.
    conv_weight = jax.random.normal(kw, (Cout, Cin, 1, 1), dtype=jnp.float32) * (1.0 / np.sqrt(Cin))

    # Compute the reference first (the kernel output aliases / donates y's buffer).
    ref = jax.block_until_ready(_reference(x, y, conv_weight))

    out = jax.block_until_ready(skip_upsample(x, y, conv_weight))

    assert out.shape == (N, Cout, 2 * H, 2 * W)
    np.testing.assert_allclose(np.asarray(out), np.asarray(ref), rtol=1e-5, atol=1e-5)

    print("KERNEL_OK")
</pallas_src>

<mosaic_0001>
module attributes {stable_mosaic.version = 11 : i64} {
  func.func @_skip_upsample_kernel(%arg0: i32, %arg1: memref<24xf32, #tpu.memory_space<smem>>, %arg2: memref<32x16xf32, #tpu.memory_space<vmem>>, %arg3: memref<16x32xf32, #tpu.memory_space<vmem>>, %arg4: memref<1x96x16xf32, #tpu.memory_space<vmem>>, %arg5: memref<1x4x32x32xf32, #tpu.memory_space<vmem>>, %arg6: memref<1x4x32x32xf32, #tpu.memory_space<vmem>>) attributes {dimension_semantics = [#tpu.dimension_semantics<parallel>], iteration_bounds = array<i64: 2>, scalar_prefetch = 0 : i64, scratch_operands = 0 : i64, tpu.core_type = #tpu.core_type<tc>, window_params = [{transform_indices = @transform_0, window_bounds = array<i64: 24>}, {pipeline_mode = #tpu.pipeline_mode<synchronous>, transform_indices = @transform_1, window_bounds = array<i64: 32, 16>}, {pipeline_mode = #tpu.pipeline_mode<synchronous>, transform_indices = @transform_2, window_bounds = array<i64: 16, 32>}, {transform_indices = @transform_3, window_bounds = array<i64: 1, 96, 16>}, {transform_indices = @transform_4, window_bounds = array<i64: 1, 4, 32, 32>}, {transform_indices = @transform_5, window_bounds = array<i64: 1, 4, 32, 32>}]} {
    %c0 = arith.constant 0 : index
    %c0_0 = arith.constant 0 : index
    %c0_1 = arith.constant 0 : index
    %0 = vector.load %arg4[%c0, %c0_0, %c0_1] : memref<1x96x16xf32, #tpu.memory_space<vmem>>, vector<1x96x16xf32>
    %1 = vector.shape_cast %0 : vector<1x96x16xf32> to vector<96x16xf32>
    %c0_2 = arith.constant 0 : index
    %c0_3 = arith.constant 0 : index
    %2 = vector.load %arg3[%c0_2, %c0_3] : memref<16x32xf32, #tpu.memory_space<vmem>>, vector<16x32xf32>
    %cst = arith.constant dense<0.000000e+00> : vector<96x32xf32>
    %3 = tpu.matmul %1, %2, %cst {dimension_numbers = #tpu.dot_dimension_numbers<[1], [0], [0], [1], [0, 0, 1, 1], [], []>} : vector<96x16xf32>, vector<16x32xf32>, vector<96x32xf32> -> vector<96x32xf32>
    %c0_4 = arith.constant 0 : index
    %4 = memref.load %arg1[%c0_4] : memref<24xf32, #tpu.memory_space<smem>>
    %5 = vector.extract_strided_slice %3 {offsets = [0, 0], sizes = [16, 32], strides = [1, 1]} : vector<96x32xf32> to vector<16x32xf32>
    %6 = vector.broadcast %4 : f32 to vector<16x32xf32>
    %7 = arith.mulf %6, %5 : vector<16x32xf32>
    %c1 = arith.constant 1 : index
    %8 = memref.load %arg1[%c1] : memref<24xf32, #tpu.memory_space<smem>>
    %9 = vector.extract_strided_slice %3 {offsets = [16, 0], sizes = [16, 32], strides = [1, 1]} : vector<96x32xf32> to vector<16x32xf32>
    %10 = vector.broadcast %8 : f32 to vector<16x32xf32>
    %11 = arith.mulf %10, %9 : vector<16x32xf32>
    %12 = arith.addf %7, %11 : vector<16x32xf32>
    %c2 = arith.constant 2 : index
    %13 = memref.load %arg1[%c2] : memref<24xf32, #tpu.memory_space<smem>>
    %14 = vector.extract_strided_slice %3 {offsets = [32, 0], sizes = [16, 32], strides = [1, 1]} : vector<96x32xf32> to vector<16x32xf32>
    %15 = vector.broadcast %13 : f32 to vector<16x32xf32>
    %16 = arith.mulf %15, %14 : vector<16x32xf32>
    %17 = arith.addf %12, %16 : vector<16x32xf32>
    %c3 = arith.constant 3 : index
    %18 = memref.load %arg1[%c3] : memref<24xf32, #tpu.memory_space<smem>>
    %19 = vector.extract_strided_slice %3 {offsets = [48, 0], sizes = [16, 32], strides = [1, 1]} : vector<96x32xf32> to vector<16x32xf32>
    %20 = vector.broadcast %18 : f32 to vector<16x32xf32>
    %21 = arith.mulf %20, %19 : vector<16x32xf32>
    %22 = arith.addf %17, %21 : vector<16x32xf32>
    %c4 = arith.constant 4 : index
    %23 = memref.load %arg1[%c4] : memref<24xf32, #tpu.memory_space<smem>>
    %24 = vector.extract_strided_slice %3 {offsets = [64, 0], sizes = [16, 32], strides = [1, 1]} : vector<96x32xf32> to vector<16x32xf32>
    %25 = vector.broadcast %23 : f32 to vector<16x32xf32>
    %26 = arith.mulf %25, %24 : vector<16x32xf32>
    %27 = arith.addf %22, %26 : vector<16x32xf32>
    %c5 = arith.constant 5 : index
    %28 = memref.load %arg1[%c5] : memref<24xf32, #tpu.memory_space<smem>>
    %29 = vector.extract_strided_slice %3 {offsets = [80, 0], sizes = [16, 32], strides = [1, 1]} : vector<96x32xf32> to vector<16x32xf32>
    %30 = vector.broadcast %28 : f32 to vector<16x32xf32>
    %31 = arith.mulf %30, %29 : vector<16x32xf32>
    %32 = arith.addf %27, %31 : vector<16x32xf32>
    %c6 = arith.constant 6 : index
    %33 = memref.load %arg1[%c6] : memref<24xf32, #tpu.memory_space<smem>>
    %34 = vector.extract_strided_slice %3 {offsets = [0, 0], sizes = [16, 32], strides = [1, 1]} : vector<96x32xf32> to vector<16x32xf32>
    %35 = vector.broadcast %33 : f32 to vector<16x32xf32>
    %36 = arith.mulf %35, %34 : vector<16x32xf32>
    %c7 = arith.constant 7 : index
    %37 = memref.load %arg1[%c7] : memref<24xf32, #tpu.memory_space<smem>>
    %38 = vector.extract_strided_slice %3 {offsets = [16, 0], sizes = [16, 32], strides = [1, 1]} : vector<96x32xf32> to vector<16x32xf32>
    %39 = vector.broadcast %37 : f32 to vector<16x32xf32>
    %40 = arith.mulf %39, %38 : vector<16x32xf32>
    %41 = arith.addf %36, %40 : vector<16x32xf32>
    %c8 = arith.constant 8 : index
    %42 = memref.load %arg1[%c8] : memref<24xf32, #tpu.memory_space<smem>>
    %43 = vector.extract_strided_slice %3 {offsets = [32, 0], sizes = [16, 32], strides = [1, 1]} : vector<96x32xf32> to vector<16x32xf32>
    %44 = vector.broadcast %42 : f32 to vector<16x32xf32>
    %45 = arith.mulf %44, %43 : vector<16x32xf32>
    %46 = arith.addf %41, %45 : vector<16x32xf32>
    %c9 = arith.constant 9 : index
    %47 = memref.load %arg1[%c9] : memref<24xf32, #tpu.memory_space<smem>>
    %48 = vector.extract_strided_slice %3 {offsets = [48, 0], sizes = [16, 32], strides = [1, 1]} : vector<96x32xf32> to vector<16x32xf32>
    %49 = vector.broadcast %47 : f32 to vector<16x32xf32>
    %50 = arith.mulf %49, %48 : vector<16x32xf32>
    %51 = arith.addf %46, %50 : vector<16x32xf32>
    %c10 = arith.constant 10 : index
    %52 = memref.load %arg1[%c10] : memref<24xf32, #tpu.memory_space<smem>>
    %53 = vector.extract_strided_slice %3 {offsets = [64, 0], sizes = [16, 32], strides = [1, 1]} : vector<96x32xf32> to vector<16x32xf32>
    %54 = vector.broadcast %52 : f32 to vector<16x32xf32>
    %55 = arith.mulf %54, %53 : vector<16x32xf32>
    %56 = arith.addf %51, %55 : vector<16x32xf32>
    %c11 = arith.constant 11 : index
    %57 = memref.load %arg1[%c11] : memref<24xf32, #tpu.memory_space<smem>>
    %58 = vector.extract_strided_slice %3 {offsets = [80, 0], sizes = [16, 32], strides = [1, 1]} : vector<96x32xf32> to vector<16x32xf32>
    %59 = vector.broadcast %57 : f32 to vector<16x32xf32>
    %60 = arith.mulf %59, %58 : vector<16x32xf32>
    %61 = arith.addf %56, %60 : vector<16x32xf32>
    %c12 = arith.constant 12 : index
    %62 = memref.load %arg1[%c12] : memref<24xf32, #tpu.memory_space<smem>>
    %63 = vector.extract_strided_slice %3 {offsets = [0, 0], sizes = [16, 32], strides = [1, 1]} : vector<96x32xf32> to vector<16x32xf32>
    %64 = vector.broadcast %62 : f32 to vector<16x32xf32>
    %65 = arith.mulf %64, %63 : vector<16x32xf32>
    %c13 = arith.constant 13 : index
    %66 = memref.load %arg1[%c13] : memref<24xf32, #tpu.memory_space<smem>>
    %67 = vector.extract_strided_slice %3 {offsets = [16, 0], sizes = [16, 32], strides = [1, 1]} : vector<96x32xf32> to vector<16x32xf32>
    %68 = vector.broadcast %66 : f32 to vector<16x32xf32>
    %69 = arith.mulf %68, %67 : vector<16x32xf32>
    %70 = arith.addf %65, %69 : vector<16x32xf32>
    %c14 = arith.constant 14 : index
    %71 = memref.load %arg1[%c14] : memref<24xf32, #tpu.memory_space<smem>>
    %72 = vector.extract_strided_slice %3 {offsets = [32, 0], sizes = [16, 32], strides = [1, 1]} : vector<96x32xf32> to vector<16x32xf32>
    %73 = vector.broadcast %71 : f32 to vector<16x32xf32>
    %74 = arith.mulf %73, %72 : vector<16x32xf32>
    %75 = arith.addf %70, %74 : vector<16x32xf32>
    %c15 = arith.constant 15 : index
    %76 = memref.load %arg1[%c15] : memref<24xf32, #tpu.memory_space<smem>>
    %77 = vector.extract_strided_slice %3 {offsets = [48, 0], sizes = [16, 32], strides = [1, 1]} : vector<96x32xf32> to vector<16x32xf32>
    %78 = vector.broadcast %76 : f32 to vector<16x32xf32>
    %79 = arith.mulf %78, %77 : vector<16x32xf32>
    %80 = arith.addf %75, %79 : vector<16x32xf32>
    %c16 = arith.constant 16 : index
    %81 = memref.load %arg1[%c16] : memref<24xf32, #tpu.memory_space<smem>>
    %82 = vector.extract_strided_slice %3 {offsets = [64, 0], sizes = [16, 32], strides = [1, 1]} : vector<96x32xf32> to vector<16x32xf32>
    %83 = vector.broadcast %81 : f32 to vector<16x32xf32>
    %84 = arith.mulf %83, %82 : vector<16x32xf32>
    %85 = arith.addf %80, %84 : vector<16x32xf32>
    %c17 = arith.constant 17 : index
    %86 = memref.load %arg1[%c17] : memref<24xf32, #tpu.memory_space<smem>>
    %87 = vector.extract_strided_slice %3 {offsets = [80, 0], sizes = [16, 32], strides = [1, 1]} : vector<96x32xf32> to vector<16x32xf32>
    %88 = vector.broadcast %86 : f32 to vector<16x32xf32>
    %89 = arith.mulf %88, %87 : vector<16x32xf32>
    %90 = arith.addf %85, %89 : vector<16x32xf32>
    %c18 = arith.constant 18 : index
    %91 = memref.load %arg1[%c18] : memref<24xf32, #tpu.memory_space<smem>>
    %92 = vector.extract_strided_slice %3 {offsets = [0, 0], sizes = [16, 32], strides = [1, 1]} : vector<96x32xf32> to vector<16x32xf32>
    %93 = vector.broadcast %91 : f32 to vector<16x32xf32>
    %94 = arith.mulf %93, %92 : vector<16x32xf32>
    %c19 = arith.constant 19 : index
    %95 = memref.load %arg1[%c19] : memref<24xf32, #tpu.memory_space<smem>>
    %96 = vector.extract_strided_slice %3 {offsets = [16, 0], sizes = [16, 32], strides = [1, 1]} : vector<96x32xf32> to vector<16x32xf32>
    %97 = vector.broadcast %95 : f32 to vector<16x32xf32>
    %98 = arith.mulf %97, %96 : vector<16x32xf32>
    %99 = arith.addf %94, %98 : vector<16x32xf32>
    %c20 = arith.constant 20 : index
    %100 = memref.load %arg1[%c20] : memref<24xf32, #tpu.memory_space<smem>>
    %101 = vector.extract_strided_slice %3 {offsets = [32, 0], sizes = [16, 32], strides = [1, 1]} : vector<96x32xf32> to vector<16x32xf32>
    %102 = vector.broadcast %100 : f32 to vector<16x32xf32>
    %103 = arith.mulf %102, %101 : vector<16x32xf32>
    %104 = arith.addf %99, %103 : vector<16x32xf32>
    %c21 = arith.constant 21 : index
    %105 = memref.load %arg1[%c21] : memref<24xf32, #tpu.memory_space<smem>>
    %106 = vector.extract_strided_slice %3 {offsets = [48, 0], sizes = [16, 32], strides = [1, 1]} : vector<96x32xf32> to vector<16x32xf32>
    %107 = vector.broadcast %105 : f32 to vector<16x32xf32>
    %108 = arith.mulf %107, %106 : vector<16x32xf32>
    %109 = arith.addf %104, %108 : vector<16x32xf32>
    %c22 = arith.constant 22 : index
    %110 = memref.load %arg1[%c22] : memref<24xf32, #tpu.memory_space<smem>>
    %111 = vector.extract_strided_slice %3 {offsets = [64, 0], sizes = [16, 32], strides = [1, 1]} : vector<96x32xf32> to vector<16x32xf32>
    %112 = vector.broadcast %110 : f32 to vector<16x32xf32>
    %113 = arith.mulf %112, %111 : vector<16x32xf32>
    %114 = arith.addf %109, %113 : vector<16x32xf32>
    %c23 = arith.constant 23 : index
    %115 = memref.load %arg1[%c23] : memref<24xf32, #tpu.memory_space<smem>>
    %116 = vector.extract_strided_slice %3 {offsets = [80, 0], sizes = [16, 32], strides = [1, 1]} : vector<96x32xf32> to vector<16x32xf32>
    %117 = vector.broadcast %115 : f32 to vector<16x32xf32>
    %118 = arith.mulf %117, %116 : vector<16x32xf32>
    %119 = arith.addf %114, %118 : vector<16x32xf32>
    %120 = tpu.concatenate %32, %61, %90, %119 in 1 : vector<16x32xf32>, vector<16x32xf32>, vector<16x32xf32>, vector<16x32xf32> -> vector<16x128xf32>
    %c0_5 = arith.constant 0 : index
    %c0_6 = arith.constant 0 : index
    %121 = vector.load %arg2[%c0_5, %c0_6] : memref<32x16xf32, #tpu.memory_space<vmem>>, vector<32x16xf32>
    %cst_7 = arith.constant dense<0.000000e+00> : vector<32x128xf32>
    %122 = tpu.matmul %121, %120, %cst_7 {dimension_numbers = #tpu.dot_dimension_numbers<[1], [0], [0], [1], [0, 0, 1, 1], [], []>} : vector<32x16xf32>, vector<16x128xf32>, vector<32x128xf32> -> vector<32x128xf32>
    %123 = vector.extract_strided_slice %122 {offsets = [0, 0], sizes = [32, 32], strides = [1, 1]} : vector<32x128xf32> to vector<32x32xf32>
    %c0_8 = arith.constant 0 : index
    %c0_9 = arith.constant 0 : index
    %c0_10 = arith.constant 0 : index
    %c0_11 = arith.constant 0 : index
    %124 = vector.load %arg5[%c0_8, %c0_9, %c0_10, %c0_11] : memref<1x4x32x32xf32, #tpu.memory_space<vmem>>, vector<1x1x32x32xf32>
    %125 = vector.shape_cast %124 : vector<1x1x32x32xf32> to vector<32x32xf32>
    %126 = arith.addf %123, %125 : vector<32x32xf32>
    %c0_12 = arith.constant 0 : index
    %c0_13 = arith.constant 0 : index
    %c0_14 = arith.constant 0 : index
    %c0_15 = arith.constant 0 : index
    %127 = vector.load %arg6[%c0_12, %c0_13, %c0_14, %c0_15] : memref<1x4x32x32xf32, #tpu.memory_space<vmem>>, vector<1x1x32x32xf32>
    %128 = vector.shape_cast %127 : vector<1x1x32x32xf32> to vector<32x32xf32>
    %129 = vector.shape_cast %126 : vector<32x32xf32> to vector<1x1x32x32xf32>
    tpu.vector_store %arg6[%c0_12, %c0_13, %c0_14, %c0_15], %129 {strides = array<i32>} : memref<1x4x32x32xf32, #tpu.memory_space<vmem>>, vector<1x1x32x32xf32>,
    %130 = vector.extract_strided_slice %122 {offsets = [0, 32], sizes = [32, 32], strides = [1, 1]} : vector<32x128xf32> to vector<32x32xf32>
    %c0_16 = arith.constant 0 : index
    %c1_17 = arith.constant 1 : index
    %c0_18 = arith.constant 0 : index
    %c0_19 = arith.constant 0 : index
    %131 = vector.load %arg5[%c0_16, %c1_17, %c0_18, %c0_19] : memref<1x4x32x32xf32, #tpu.memory_space<vmem>>, vector<1x1x32x32xf32>
    %132 = vector.shape_cast %131 : vector<1x1x32x32xf32> to vector<32x32xf32>
    %133 = arith.addf %130, %132 : vector<32x32xf32>
    %c0_20 = arith.constant 0 : index
    %c1_21 = arith.constant 1 : index
    %c0_22 = arith.constant 0 : index
    %c0_23 = arith.constant 0 : index
    %134 = vector.load %arg6[%c0_20, %c1_21, %c0_22, %c0_23] : memref<1x4x32x32xf32, #tpu.memory_space<vmem>>, vector<1x1x32x32xf32>
    %135 = vector.shape_cast %134 : vector<1x1x32x32xf32> to vector<32x32xf32>
    %136 = vector.shape_cast %133 : vector<32x32xf32> to vector<1x1x32x32xf32>
    tpu.vector_store %arg6[%c0_20, %c1_21, %c0_22, %c0_23], %136 {strides = array<i32>} : memref<1x4x32x32xf32, #tpu.memory_space<vmem>>, vector<1x1x32x32xf32>,
    %137 = vector.extract_strided_slice %122 {offsets = [0, 64], sizes = [32, 32], strides = [1, 1]} : vector<32x128xf32> to vector<32x32xf32>
    %c0_24 = arith.constant 0 : index
    %c2_25 = arith.constant 2 : index
    %c0_26 = arith.constant 0 : index
    %c0_27 = arith.constant 0 : index
    %138 = vector.load %arg5[%c0_24, %c2_25, %c0_26, %c0_27] : memref<1x4x32x32xf32, #tpu.memory_space<vmem>>, vector<1x1x32x32xf32>
    %139 = vector.shape_cast %138 : vector<1x1x32x32xf32> to vector<32x32xf32>
    %140 = arith.addf %137, %139 : vector<32x32xf32>
    %c0_28 = arith.constant 0 : index
    %c2_29 = arith.constant 2 : index
    %c0_30 = arith.constant 0 : index
    %c0_31 = arith.constant 0 : index
    %141 = vector.load %arg6[%c0_28, %c2_29, %c0_30, %c0_31] : memref<1x4x32x32xf32, #tpu.memory_space<vmem>>, vector<1x1x32x32xf32>
    %142 = vector.shape_cast %141 : vector<1x1x32x32xf32> to vector<32x32xf32>
    %143 = vector.shape_cast %140 : vector<32x32xf32> to vector<1x1x32x32xf32>
    tpu.vector_store %arg6[%c0_28, %c2_29, %c0_30, %c0_31], %143 {strides = array<i32>} : memref<1x4x32x32xf32, #tpu.memory_space<vmem>>, vector<1x1x32x32xf32>,
    %144 = vector.extract_strided_slice %122 {offsets = [0, 96], sizes = [32, 32], strides = [1, 1]} : vector<32x128xf32> to vector<32x32xf32>
    %c0_32 = arith.constant 0 : index
    %c3_33 = arith.constant 3 : index
    %c0_34 = arith.constant 0 : index
    %c0_35 = arith.constant 0 : index
    %145 = vector.load %arg5[%c0_32, %c3_33, %c0_34, %c0_35] : memref<1x4x32x32xf32, #tpu.memory_space<vmem>>, vector<1x1x32x32xf32>
    %146 = vector.shape_cast %145 : vector<1x1x32x32xf32> to vector<32x32xf32>
    %147 = arith.addf %144, %146 : vector<32x32xf32>
    %c0_36 = arith.constant 0 : index
    %c3_37 = arith.constant 3 : index
    %c0_38 = arith.constant 0 : index
    %c0_39 = arith.constant 0 : index
    %148 = vector.load %arg6[%c0_36, %c3_37, %c0_38, %c0_39] : memref<1x4x32x32xf32, #tpu.memory_space<vmem>>, vector<1x1x32x32xf32>
    %149 = vector.shape_cast %148 : vector<1x1x32x32xf32> to vector<32x32xf32>
    %150 = vector.shape_cast %147 : vector<32x32xf32> to vector<1x1x32x32xf32>
    tpu.vector_store %arg6[%c0_36, %c3_37, %c0_38, %c0_39], %150 {strides = array<i32>} : memref<1x4x32x32xf32, #tpu.memory_space<vmem>>, vector<1x1x32x32xf32>,
    return
  }
  func.func @transform_0(%arg0: i32) -> i32 {
    %c0_i32 = arith.constant 0 : i32
    %c0_i32_0 = arith.constant 0 : i32
    return %c0_i32 : i32
  }
  func.func @transform_1(%arg0: i32) -> (i32, i32) {
    %c0_i32 = arith.constant 0 : i32
    %c0_i32_0 = arith.constant 0 : i32
    %c0_i32_1 = arith.constant 0 : i32
    return %c0_i32, %c0_i32_0 : i32, i32
  }
  func.func @transform_2(%arg0: i32) -> (i32, i32) {
    %c0_i32 = arith.constant 0 : i32
    %c0_i32_0 = arith.constant 0 : i32
    %c0_i32_1 = arith.constant 0 : i32
    return %c0_i32, %c0_i32_0 : i32, i32
  }
  func.func @transform_3(%arg0: i32) -> (i32, i32, i32) {
    %c0_i32 = arith.constant 0 : i32
    %c0_i32_0 = arith.constant 0 : i32
    %c0_i32_1 = arith.constant 0 : i32
    return %arg0, %c0_i32, %c0_i32_0 : i32, i32, i32
  }
  func.func @transform_4(%arg0: i32) -> (i32, i32, i32, i32) {
    %c0_i32 = arith.constant 0 : i32
    %c0_i32_0 = arith.constant 0 : i32
    %c0_i32_1 = arith.constant 0 : i32
    %c0_i32_2 = arith.constant 0 : i32
    return %arg0, %c0_i32, %c0_i32_0, %c0_i32_1 : i32, i32, i32, i32
  }
  func.func @transform_5(%arg0: i32) -> (i32, i32, i32, i32) {
    %c0_i32 = arith.constant 0 : i32
    %c0_i32_0 = arith.constant 0 : i32
    %c0_i32_1 = arith.constant 0 : i32
    %c0_i32_2 = arith.constant 0 : i32
    return %arg0, %c0_i32, %c0_i32_0, %c0_i32_1 : i32, i32, i32, i32
  }
}

</mosaic_0001>

<bundles_post_ra>
// kernel: tpu_custom_call.1
= control target key start
LH: loop header
LB: loop body
LE: loop exit
PB: predicated region body
PF: predicated region fallthrough
CT: control target
= control target key end

     0   :  { %s1810_s0 = inlined_call_operand.vmem [shape: f32[24], index: 0, kind: input, shape index: {}]   ;;  %s1811_s1 = inlined_call_operand.vmem [shape: f32[32,16], index: 1, kind: input, shape index: {}]   ;;  %s1812_s2 = inlined_call_operand.vmem [shape: f32[16,32], index: 2, kind: input, shape index: {}]   ;;  %s1813_s3 = inlined_call_operand.vmem [shape: f32[2,96,16], index: 3, kind: input, shape index: {}]   ;;  %s1814_s4 = inlined_call_operand.hbm [shape: f32[2,4,32,32], index: 4, kind: input, shape index: {}, may-alias: {4,5}]   ;;  %s1815_s5 = inlined_call_operand.hbm [shape: f32[2,4,32,32], index: 5, kind: output, shape index: {}, may-alias: {4,5}]  }
   0x1   :  { %1826 = sst [smem:[#allocation17_spill]] %s1810_s0 }
   0x2   :  { %1827 = sst [smem:[#allocation18_spill]] %s1812_s2 }
   0x3   :  { %1828 = sst [smem:[#allocation19_spill]] %s1813_s3 }
   0x4   :  { %1829 = sst [smem:[#allocation20_spill]] %s1814_s4 }
   0x5   :  { %10 = vsyncpa [#allocation5], 0 }
   0x6   :  { %11 = vsyncpa [#allocation3], 0 }
   0x7   :  { %13 = vsyncpa [#allocation3 + $0x1], 0 }
   0x8   :  { %14 = vsyncpa [#allocation4], 0 }
   0x9   :  { %16 = vsyncpa [#allocation4 + $0x1], 0  ;;  %s1365_s18 = smov 0   ;;  %s1367_s19 = smov 0  }
   0xa   :  { %s1369_s20 = smov 0   ;;  %s1371_s21 = smov 0  }
   0xb LB: > { %1830 = sst [smem:[#allocation11_spill]] %s1315_s19  ;;  %s1386_s22 = sadd.s32 4294967295, %s1323_s21   ;;  %s1323_s21 = sphi %s1371_s21, %s1856_s21   ;;  %s1319_s20 = sphi %s1369_s20, %s1859_s20   ;;  %s1315_s19 = sphi %s1367_s19, %s1858_s19   ;;  %s1311_s18 = sphi %s1365_s18, %s1857_s18  }
   0xc   : > { %1831 = sst [smem:[#allocation12_spill]] %s1319_s20  ;;  %s984_s23 = sadd.s32 4294967294, %s1323_s21  }
   0xd   : > { %1832 = sst [smem:[#allocation13_spill]] %s1323_s21  ;;  %s1390_s24 = sadd.s32 1, %s1323_s21  }
   0xe   : > { %1833 = sst [smem:[#allocation14_spill]] %s1390_s24  ;;  %s118_s25 = sadd.s32 1, %s1319_s20 }
   0xf   : > { %s115_s26 = ssub.s32 %s1323_s21, %s1390_s24  ;;  %p125_p0 = scmp.ne.s32.totalorder %s1319_s20, %s1315_s19 }
  0x10   : > { %p116_p1 = scmp.eq.s32.totalorder %s115_s26, 0  ;;  %p126_p2 = scmp.eq.s32.totalorder %s1323_s21, 0 }
  0x11   : > { %p131_p3 = scmp.ne.s32.totalorder %s1315_s19, %s1311_s18  ;;  %p1817_p4 = scmp.eq.s32.totalorder %s1386_s22, 0 }
  0x12   : > { %s1402_s27 = scalar_select %p116_p1, %s1319_s20, %s118_s25  }
  0x13   : > { %p1404_p5 = por %p126_p2, %p125_p0  ;;  %p1410_p6 = por %p1817_p4, %p131_p3 }
  0x14   : > { %1834 = sst [smem:[#allocation15_spill]] %s1402_s27  ;;  %p155_p7 = scmp.eq.s32.totalorder %s1386_s22, 1 }
  0x15   : > { %s1836_s29 = scalar_select %p1410_p6, 1, 0 }
  0x16   : > { %p161_p8 = scmp.eq.s32.totalorder %s984_s23, 1  ;;  %p985_p9 = scmp.ge.s32.totalorder %s1323_s21, 1 }
  0x17   : > { %p168_p10 = scmp.lt.s32.totalorder %s1323_s21, 3  ;;  %p1417_p11 = por %p155_p7, %p125_p0 }
  0x18   : > { %p1421_p12 = por %p161_p8, %p131_p3  ;;  %s1841_s0 = sld [smem:[#allocation17_spill]] }
  0x19   : > { %s1837_s30 = scalar_select %p1417_p11, 1, 0 }
  0x1a   : > { %s1838_s6 = scalar_select %p1421_p12, 1, 0 }
  0x1b   : > { %p1425_p13 = pnand %p985_p9, %p168_p10  ;;  %p1150_p2 = scmp.lt.s32.totalorder %s1323_s21, 2 }
  0x1c   : > { %1839 = sst [smem:[#allocation16_spill]] %s1838_s6  ;;  %s206_s12 = sand.u32 1, %s1319_s20  }
  0x1d   : > { %p1137_p1 = pneg %p1425_p13  ;;  %p1445_p3 = pnand %p1150_p2, %p1404_p5 }
  0x1e   : > { %s181_s10 = sshll.u32 %s1841_s0, 4  ;;  %s988_s14 = sshll.u32 %s206_s12, 7  ;;  %s182_s10 = int_to_ptr.vmem [resolvable:$true] %s181_s10 }
  0x1f   : > { %p1438_p7 = pnand %p1137_p1, %p1817_p4  ;;  %s1208_s15 = scalar_lea.vmem %s182_s10, 16 }
  0x20   : > { %p1209_p8 = scmp.ne.s32.totalorder %s182_s10, %s1208_s15  ;;  %p1216_p12 = scmp.lt.s32.totalorder %s182_s10, %s182_s10 }
  0x21   : > { %p1210_p9 = pneg %p1438_p7  ;;  %p1217_p11 = scmp.lt.s32.totalorder %s1208_s15, %s1208_s15 }
  0x23   : > { %p1211_p10 = pnand %p1210_p9, %p1209_p8  ;;  %p1218_p1 = por %p1217_p11, %p1216_p12 }
  0x25   : > { %p1212_p0 = pneg %p1211_p10 }
  0x27   : > { %p1219_p4 = pnand %p1218_p1, %p1212_p0 }
  0x29   : > { %1222 = shalt.err (!%p1219_p4)
}
  0x2a   : > { %s1325_s16 = smov [#allocation2]   ;;  %s1064_s17 = sshll.u32 %s1323_s21, 11 }
  0x2b   : > { %1140 = dma.vmem_to_smem (!%p1438_p7), %s182_s10, 16, %s1325_s16, [#allocation5]  }
  0x2c   : > { %s210_s23 = scalar_lea.vmem [#allocation6], %s988_s14  ;;  %s1844_s4 = sld [smem:[#allocation20_spill]] }
  0x2d   : > { %s217_s25 = sshll.u32 %s210_s23, 4  ;;  %s1461_s9 = scalar_lea.sflag [#allocation3], %s206_s12  ;;  %s1459_s25 = int_to_ptr.vmem [resolvable:$true] %s217_s25 }
  0x2e   : > { %p1225_p5 = pneg %p1445_p3 }
  0x32   : > { %s1457_s8 = scalar_lea.hbm %s1844_s4, %s1064_s17  ;;  %s1228_s15 = scalar_lea.hbm %s1844_s4, 4096 }
  0x33   : > { %s1223_s11 = scalar_lea.hbm %s1457_s8, 2048  ;;  %p1229_p0 = scmp.lt.u32.totalorder %s1457_s8, %s1844_s4 }
  0x34   : > { %p1224_p4 = scmp.ne.s32.totalorder %s1457_s8, %s1223_s11  ;;  %p1230_p2 = scmp.lt.u32.totalorder %s1228_s15, %s1223_s11 }
  0x35   : > { %p1232_p8 = scmp.lt.u32.totalorder %s1223_s11, %s1457_s8 }
  0x36   : > { %p1226_p11 = pnand %p1225_p5, %p1224_p4  ;;  %p1231_p7 = por %p1230_p2, %p1229_p0 }
  0x38   : > { %p1227_p12 = pneg %p1226_p11  ;;  %p1233_p9 = por %p1232_p8, %p1231_p7 }
  0x3a   : > { %p1234_p10 = pnand %p1233_p9, %p1227_p12 }
  0x3c   : > { %1237 = shalt.err (!%p1234_p10)
}
  0x3d   : > { %s1238_s12 = scalar_lea.vmem %s1459_s25, 2048  ;;  %s1326_s23 = smov [#allocation6]  }
  0x3e   : > { %p1239_p1 = scmp.ne.s32.totalorder %s1459_s25, %s1238_s12  ;;  %s1243_s26 = sshll.u32 %s1326_s23, 4  ;;  %s1244_s26 = int_to_ptr.vmem [resolvable:$false] %s1243_s26 }
  0x3f   : > { %s1245_s28 = scalar_lea.vmem %s1244_s26, 4096  ;;  %p1246_p6 = scmp.lt.s32.totalorder %s1459_s25, %s1244_s26 }
  0x40   : > { %p1241_p4 = pnand %p1239_p1, %p1225_p5  ;;  %p1247_p0 = scmp.lt.s32.totalorder %s1245_s28, %s1238_s12 }
  0x42   : > { %p1242_p11 = pneg %p1241_p4  ;;  %p1248_p2 = por %p1247_p0, %p1246_p6 }
  0x44   : > { %p1249_p7 = pnand %p1248_p2, %p1242_p11 }
  0x46   : > { %1252 = shalt.err (!%p1249_p7)
}
  0x47   : > { %s1327_s11 = smov 128   ;;  %s1328_s10 = smov 8  }
  0x48   : > { %1144 = dma.hbm_to_vmem [thread:$0]  (!%p1445_p3), %s1457_s8, 2048, %s1459_s25, %s1461_s9, %s1327_s11, %s1327_s11, %s1328_s10  }
  0x49   : > { %229 = sbr.rel (%p1425_p13) target bundleno = 832 (0x340), region = 40  ;;  %p1845_p5 = scmp.eq.s32.totalorder (!%p1425_p13), %s1386_s22, 0 }
  0x50   : > { %1298 = dma.done.wait (%p1845_p5), [#allocation5], 16   ;;  %p1846_p12 = pmov %p1845_p5 }
  0x51   : > { %s1496_s14 = sand.u32 1, %s1315_s19   ;;  %p1847_p6 = scmp.ne.s32.totalorder %s1836_s29, 0 }
  0x52   : > { %1300 = vsyncadd (%p1846_p12), [#allocation5], 4294967280  ;;  %s1819_s15 = sshll.u32 %s1496_s14, 7  ;;  %s236_s16 = scalar_lea.sflag [#allocation3], %s1496_s14 }
  0x53   : > { %s1502_s13 = scalar_lea.vmem [#allocation6], %s1819_s15 }
  0x54   : > { %1302 = dma.done.wait (%p1847_p6), %s236_s16, 2048  }
  0x55   : > { %1304 = vsyncadd (%p1847_p6), %s236_s16, 4294965248 }
  0x56   : > { %244 = sfence }
  0x57   : > { %s1848_s2 = sld [smem:[#allocation18_spill]]  ;;  %p272_p13 = scmp.lt.s32.totalorder %s1386_s22, 1  ;;  %vm291_vm0 = vcmask 130048   ;;  %vm613_vm1 = vcmask 261120   ;;  %vm616_vm2 = vcmask 523264   ;;  %vm619_vm3 = vcmask 785408  }
  0x58   : > { %s1849_s3 = sld [smem:[#allocation19_spill]]  ;;  %s1531_s28 = sld [smem:[#allocation2]] }
  0x59   : > { %s273_s17 = scalar_select %p272_p13, %s1386_s22, 1 }
  0x5a   : > { %s1533_s11 = sld [smem:[#allocation2 + $0x6]]  ;;  %s1535_s10 = sld [smem:[#allocation2 + $0xc]] }
  0x5b   : > { %s1128_s12 = smul.u32 96, %s273_s17  ;;  %s1537_s16 = sld [smem:[#allocation2 + $0x12]] }
  0x5c   : > { %s1539_s7 = sld [smem:[#allocation2 + $0x1]]  ;;  %s1541_s25 = sld [smem:[#allocation2 + $0x7]] }
  0x5d   : > { %v289_v0 = vld [vmem:[%s1848_s2] sm:$0xff]  ;;  %v290_v1 = vld [vmem:[%s1848_s2 + $0x8] sm:$0xff]  ;;  %s1543_s8 = sld [smem:[#allocation2 + $0xd]]  ;;  %s1545_s9 = sld [smem:[#allocation2 + $0x13]] }
  0x5e   : > { %v1118_v2 = vpack.c.bf16 %v290_v1, %v289_v0  ;;  %s276_s26 = scalar_lea.vmem %s1849_s3, %s1128_s12  ;;  %s1547_s17 = sld [smem:[#allocation2 + $0x2]]  ;;  %v454_v15 = vstv %s1531_s28 }
  0x5f   : > { %v277_v3 = vld [vmem:[%s276_s26] sm:$0xff]  ;;  %v278_v4 = vld [vmem:[%s276_s26 + $0x8] sm:$0xff]  ;;  %v279_v5 = vld [vmem:[%s276_s26 + $0x10] sm:$0xff]  ;;  %s1549_s12 = sld [smem:[#allocation2 + $0x8]]  ;;  %s1551_s29 = sld [smem:[#allocation2 + $0xe]] }
  0x60   : > { %1119 = vmatprep.subr.bf16.mxu0 %v1118_v2  ;;  %1126 = vmatprep.subr.bf16.mxu1 %v1118_v2  ;;  %v285_v6 = vld [vmem:[%s276_s26 + $0x40] sm:$0xff]  ;;  %v286_v7 = vld [vmem:[%s276_s26 + $0x48] sm:$0xff]  ;;  %v280_v8 = vld [vmem:[%s276_s26 + $0x18] sm:$0xff]  ;;  %s1553_s23 = sld [smem:[#allocation2 + $0x14]]  ;;  %s1557_s15 = sld [smem:[#allocation2 + $0xa]]  ;;  %v488_v16 = vstv %s1533_s11 }
  0x61   : > { %1121 = vmatpush3.bf16.msra.mxu0 %v1118_v2  ;;  %1127 = vmatpush3.bf16.msra.mxu1 %v1118_v2  ;;  %v287_v9 = vld [vmem:[%s276_s26 + $0x50] sm:$0xff]  ;;  %v281_v10 = vld [vmem:[%s276_s26 + $0x20] sm:$0xff]  ;;  %v288_v11 = vld [vmem:[%s276_s26 + $0x58] sm:$0xff]  ;;  %s1559_s0 = sld [smem:[#allocation2 + $0x10]]  ;;  %s1561_s2 = sld [smem:[#allocation2 + $0x16]]  ;;  %v522_v17 = vstv %s1535_s10 }
  0x62   : > { %1090 = vmatprep.mubr.msk.f32.mxu0 %vm291_vm0, %v277_v3  ;;  %1102 = vmatprep.mubr.msk.f32.mxu1 %vm291_vm0, %v285_v6  ;;  %v282_v12 = vld [vmem:[%s276_s26 + $0x28] sm:$0xff]  ;;  %v283_v13 = vld [vmem:[%s276_s26 + $0x30] sm:$0xff]  ;;  %v284_v14 = vld [vmem:[%s276_s26 + $0x38] sm:$0xff]  ;;  %s1555_s26 = sld [smem:[#allocation2 + $0x4]]  ;;  %s1563_s3 = sld [smem:[#allocation2 + $0x3]]  ;;  %v556_v18 = vstv %s1537_s16 }
  0x63   : > { %s1565_s4 = sld [smem:[#allocation2 + $0x9]]  ;;  %s1567_s27 = sld [smem:[#allocation2 + $0xf]]  ;;  %v458_v19 = vstv %s1539_s7  ;;  %v492_v20 = vstv %s1541_s25  ;;  %v526_v21 = vstv %s1543_s8  ;;  %v560_v22 = vstv %s1545_s9 }
  0x64   : > { %1091 = vmatmul.mubr.msk.f32.vlgmr.msra.gmra.mrb[0].mxu0 %vm291_vm0, %v278_v4  ;;  %1103 = vmatmul.mubr.msk.f32.vlgmr.msra.gmra.mrb[0].mxu1 %vm291_vm0, %v286_v7  ;;  %s1569_s20 = sld [smem:[#allocation2 + $0x15]]  ;;  %s1573_s24 = sld [smem:[#allocation2 + $0x11]]  ;;  %v464_v23 = vstv %s1547_s17 }
  0x65   : > { %1093 = vmatprep.mubr.msk.f32.mxu0 %vm291_vm0, %v279_v5  ;;  %1105 = vmatprep.mubr.msk.f32.mxu1 %vm291_vm0, %v287_v9  ;;  %s1571_s19 = sld [smem:[#allocation2 + $0x5]]  ;;  %s1575_s21 = sld [smem:[#allocation2 + $0x17]]  ;;  %v498_v24 = vstv %s1549_s12  ;;  %v532_v25 = vstv %s1551_s29 }
  0x66   : > { %s1577_s6 = sld [smem:[#allocation2 + $0xb]]  ;;  %v566_v26 = vstv %s1553_s23  ;;  %v510_v28 = vstv %s1557_s15  ;;  %s1850_s28 = sshll.u32 %s1496_s14, 7 }
  0x67   : > { %v544_v29 = vstv %s1559_s0  ;;  %v578_v30 = vstv %s1561_s2  ;;  %s1329_s0 = smov 96   ;;  %s1712_s11 = scalar_lea.vmem [#allocation7], %s1850_s28 }
  0x68   : > { %1094 = vmatmul.mubr.msk.f32.gmra.mrb[2].mxu0 %vm291_vm0, %v280_v8  ;;  %1106 = vmatmul.mubr.msk.f32.gmra.mrb[2].mxu1 %vm291_vm0, %v288_v11  ;;  %v476_v27 = vstv %s1555_s26  ;;  %v470_v31 = vstv %s1563_s3  ;;  %s887_s10 = sshll.u32 %s1712_s11, 4  ;;  %p1851_p8 = scmp.ne.s32.totalorder %s1837_s30, 0  ;;  %s1762_s10 = int_to_ptr.vmem [resolvable:$true] %s887_s10 }
  0x69   : > { %1096 = vmatprep.mubr.msk.f32.mxu0 %vm291_vm0, %v281_v10  ;;  %v504_v32 = vstv %s1565_s4  ;;  %v538_v33 = vstv %s1567_s27  ;;  %s1330_s4 = smov 32   ;;  %s1253_s8 = scalar_lea.vmem %s1762_s10, 2048 }
  0x6a   : > { %v572_v34 = vstv %s1569_s20  ;;  %v550_v37 = vstv %s1573_s24  ;;  %p1254_p3 = scmp.ne.s32.totalorder %s1762_s10, %s1253_s8  ;;  %s1332_s9 = smov [#allocation7]  }
  0x6b   : > { %v482_v36 = vstv %s1571_s19  ;;  %v584_v38 = vstv %s1575_s21  ;;  %s1331_s19 = smov 64   ;;  %s1257_s17 = sshll.u32 %s1332_s9, 4  ;;  %s1258_s17 = int_to_ptr.vmem [resolvable:$false] %s1257_s17 }
  0x6c   : > { %1097 = vmatmul.mubr.msk.f32.gmra.mrb[4].mxu0 %vm291_vm0, %v282_v12  ;;  %v516_v39 = vstv %s1577_s6  ;;  %p1255_p9 = pnand %p1254_p3, %p1851_p8  ;;  %s1259_s12 = scalar_lea.vmem %s1258_s17, 4096 }
  0x6d   : > { %1099 = vmatprep.mubr.msk.f32.mxu0 %vm291_vm0, %v283_v13  ;;  %p1260_p1 = scmp.lt.s32.totalorder %s1762_s10, %s1258_s17  ;;  %p1261_p4 = scmp.lt.s32.totalorder %s1259_s12, %s1253_s8 }
  0x6e   : > { %p1256_p10 = pneg %p1255_p9 }
  0x6f   : > { %p1262_p11 = por %p1261_p4, %p1260_p1 }
  0x70   : > { %1100 = vmatmul.mubr.msk.f32.gmra.mrb[6].mxu0 %vm291_vm0, %v284_v14 }
  0x71   : > { %p1263_p0 = pnand %p1262_p11, %p1256_p10 }
 0x137   : > { %v1092_v35 = vpop.f32.mrb[0].mxu0  ;;  %v1104_v49 = vpop.f32.mrb[0].mxu1 }
 0x138   : > { %v456_v40 = vmul.f32 %v1092_v35, %v454_v15  ;;  %v490_v41 = vmul.f32 %v1092_v35, %v488_v16  ;;  %v524_v42 = vmul.f32 %v1092_v35, %v522_v17  ;;  %v558_v43 = vmul.f32 %v1092_v35, %v556_v18  ;;  %v394_v44 = vpop.f32.mrb[1].mxu0  ;;  %v434_v54 = vpop.f32.mrb[1].mxu1 }
 0x139   : > { %v455_v45 = vmul.f32 %v454_v15, %v394_v44  ;;  %v489_v46 = vmul.f32 %v488_v16, %v394_v44  ;;  %v523_v47 = vmul.f32 %v522_v17, %v394_v44  ;;  %v557_v48 = vmul.f32 %v556_v18, %v394_v44 }
 0x13a   : > { %v1603_v50 = vmul.f32 %v1104_v49, %v476_v27  ;;  %v1605_v51 = vmul.f32 %v1104_v49, %v510_v28  ;;  %v1607_v52 = vmul.f32 %v1104_v49, %v544_v29  ;;  %v1609_v53 = vmul.f32 %v1104_v49, %v578_v30 }
 0x13b   : > { %v1095_v55 = vpop.f32.mrb[2].mxu0  ;;  %v1611_v56 = vmul.f32 %v476_v27, %v434_v54  ;;  %v1613_v57 = vmul.f32 %v510_v28, %v434_v54  ;;  %v545_v58 = vmul.f32 %v544_v29, %v434_v54  ;;  %v579_v59 = vmul.f32 %v578_v30, %v434_v54  ;;  %v1615_v5 = vpop.f32.mrb[2].mxu1 }
 0x13c   : > { %v460_v60 = vmul.f32 %v1095_v55, %v458_v19  ;;  %v494_v61 = vmul.f32 %v1095_v55, %v492_v20  ;;  %v528_v62 = vmul.f32 %v1095_v55, %v526_v21  ;;  %v562_v63 = vmul.f32 %v1095_v55, %v560_v22  ;;  %v404_v0 = vpop.f32.mrb[3].mxu0  ;;  %v444_v10 = vpop.f32.mrb[3].mxu1 }
 0x13d   : > { %v459_v1 = vmul.f32 %v458_v19, %v404_v0  ;;  %v493_v2 = vmul.f32 %v492_v20, %v404_v0  ;;  %v527_v3 = vmul.f32 %v526_v21, %v404_v0  ;;  %v561_v4 = vmul.f32 %v560_v22, %v404_v0 }
 0x13e   : > { %v462_v6 = vadd.f32 %v460_v60, %v456_v40  ;;  %v496_v7 = vadd.f32 %v494_v61, %v490_v41  ;;  %v530_v8 = vadd.f32 %v528_v62, %v524_v42  ;;  %v564_v9 = vadd.f32 %v562_v63, %v558_v43 }
 0x13f   : > { %v461_v11 = vadd.f32 %v459_v1, %v455_v45  ;;  %v495_v12 = vadd.f32 %v493_v2, %v489_v46  ;;  %v529_v13 = vadd.f32 %v527_v3, %v523_v47  ;;  %v563_v14 = vadd.f32 %v561_v4, %v557_v48  ;;  %v1098_v15 = vpop.f32.mrb[4].mxu0 }
 0x140   : > { %v466_v16 = vmul.f32 %v1098_v15, %v464_v23  ;;  %v500_v17 = vmul.f32 %v1098_v15, %v498_v24  ;;  %v534_v18 = vmul.f32 %v1098_v15, %v532_v25  ;;  %v568_v27 = vmul.f32 %v1098_v15, %v566_v26  ;;  %v414_v19 = vpop.f32.mrb[5].mxu0 }
 0x141   : > { %v465_v20 = vmul.f32 %v464_v23, %v414_v19  ;;  %v499_v21 = vmul.f32 %v498_v24, %v414_v19  ;;  %v533_v22 = vmul.f32 %v532_v25, %v414_v19  ;;  %v567_v28 = vmul.f32 %v566_v26, %v414_v19  ;;  %v1044_v19 = vld [vmem:[%s1502_s13 + $0x48] sm:$0xff] }
 0x142   : > { %v468_v29 = vadd.f32 %v466_v16, %v462_v6  ;;  %v502_v30 = vadd.f32 %v500_v17, %v496_v7  ;;  %v536_v35 = vadd.f32 %v534_v18, %v530_v8  ;;  %v570_v40 = vadd.f32 %v568_v27, %v564_v9  ;;  %v1038_v18 = vld [vmem:[%s1502_s13 + $0x38] sm:$0xff]  ;;  %v1043_v27 = vld [vmem:[%s1502_s13 + $0x40] sm:$0xff] }
 0x143   : > { %v1101_v41 = vpop.f32.mrb[6].mxu0  ;;  %v467_v42 = vadd.f32 %v465_v20, %v461_v11  ;;  %v501_v43 = vadd.f32 %v499_v21, %v495_v12  ;;  %v535_v44 = vadd.f32 %v533_v22, %v529_v13  ;;  %v569_v23 = vadd.f32 %v567_v28, %v563_v14  ;;  %v1045_v20 = vld [vmem:[%s1502_s13 + $0x50] sm:$0xff]  ;;  %v1046_v21 = vld [vmem:[%s1502_s13 + $0x58] sm:$0xff]  ;;  %v1051_v22 = vld [vmem:[%s1502_s13 + $0x60] sm:$0xff] }
 0x144   : > { %v424_v45 = vpop.f32.mrb[7].mxu0  ;;  %v472_v24 = vmul.f32 %v1101_v41, %v470_v31  ;;  %v506_v25 = vmul.f32 %v1101_v41, %v504_v32  ;;  %v540_v26 = vmul.f32 %v1101_v41, %v538_v33  ;;  %v574_v46 = vmul.f32 %v1101_v41, %v572_v34  ;;  %v1052_v28 = vld [vmem:[%s1502_s13 + $0x68] sm:$0xff] }
 0x145   : > { %v471_v47 = vmul.f32 %v470_v31, %v424_v45  ;;  %v505_v48 = vmul.f32 %v504_v32, %v424_v45  ;;  %v539_v49 = vmul.f32 %v538_v33, %v424_v45  ;;  %v573_v54 = vmul.f32 %v572_v34, %v424_v45 }
 0x146   : > { %v474_v55 = vadd.f32 %v472_v24, %v468_v29  ;;  %v542_v60 = vadd.f32 %v540_v26, %v536_v35  ;;  %v484_v61 = vmul.f32 %v1615_v5, %v482_v36  ;;  %v552_v62 = vmul.f32 %v1615_v5, %v550_v37  ;;  %v1053_v29 = vld [vmem:[%s1502_s13 + $0x70] sm:$0xff] }
 0x147   : > { %v473_v63 = vadd.f32 %v471_v47, %v467_v42  ;;  %v507_v0 = vadd.f32 %v505_v48, %v501_v43  ;;  %v541_v1 = vadd.f32 %v539_v49, %v535_v44  ;;  %v575_v31 = vadd.f32 %v573_v54, %v569_v23 }
 0x148   : > { %v480_v32 = vadd.f32 %v1603_v50, %v474_v55  ;;  %v483_v33 = vmul.f32 %v482_v36, %v444_v10  ;;  %v551_v34 = vmul.f32 %v550_v37, %v444_v10  ;;  %v576_v2 = vadd.f32 %v574_v46, %v570_v40  ;;  %v623_v55 = vld [vmem:[%s1811_s1 + $0x8] sm:$0xff] }
 0x149   : > { %v479_v3 = vadd.f32 %v1611_v56, %v473_v63  ;;  %v547_v4 = vadd.f32 %v545_v58, %v541_v1  ;;  %v581_v6 = vadd.f32 %v579_v59, %v575_v31  ;;  %v585_v7 = vmul.f32 %v584_v38, %v444_v10 }
 0x14a   : > { %v1647_v8 = vadd.f32 %v484_v61, %v480_v32  ;;  %v582_v9 = vadd.f32 %v1609_v53, %v576_v2  ;;  %v586_v11 = vmul.f32 %v1615_v5, %v584_v38  ;;  %v508_v50 = vadd.f32 %v506_v25, %v502_v30  ;;  %v1054_v30 = vld [vmem:[%s1502_s13 + $0x78] sm:$0xff] }
 0x14b   : > { %v485_v12 = vadd.f32 %v483_v33, %v479_v3  ;;  %v587_v36 = vadd.f32 %v585_v7, %v581_v6  ;;  %v513_v37 = vadd.f32 %v1613_v57, %v507_v0  ;;  %v517_v13 = vmul.f32 %v516_v39, %v444_v10  ;;  %v1037_v10 = vld [vmem:[%s1502_s13 + $0x30] sm:$0xff]  ;;  %v625_v61 = vld [vmem:[%s1811_s1 + $0x18] sm:$0xff]  ;;  %v724_v33 = vld [vmem:[%s1502_s13 + $0x8] sm:$0xff] }
 0x14c   : > { %v588_v14 = vadd.f32 %v586_v11, %v582_v9  ;;  %v514_v56 = vadd.f32 %v1605_v51, %v508_v50  ;;  %v518_v58 = vmul.f32 %v1615_v5, %v516_v39  ;;  %v548_v59 = vadd.f32 %v1607_v52, %v542_v60  ;;  %v622_v39 = vld [vmem:[%s1811_s1] sm:$0xff]  ;;  %v1036_v5 = vld [vmem:[%s1502_s13 + $0x28] sm:$0xff]  ;;  %v624_v60 = vld [vmem:[%s1811_s1 + $0x10] sm:$0xff] }
 0x14d   : > { %v519_v53 = vadd.f32 %v517_v13, %v513_v37  ;;  %v553_v15 = vadd.f32 %v551_v34, %v547_v4  ;;  %1112 = vmatprep.mubr.msk.f32.mxu1 %vm291_vm0, %v622_v39  ;;  %v1035_v52 = vld [vmem:[%s1502_s13 + $0x20] sm:$0xff]  ;;  %v726_v50 = vld [vmem:[%s1502_s13 + $0x18] sm:$0xff] }
 0x14e   : > { %v1203_v38 = vpack.i.bf16 %v588_v14, %v587_v36  ;;  %v520_v16 = vadd.f32 %v518_v58, %v514_v56  ;;  %v554_v17 = vadd.f32 %v552_v62, %v548_v59  ;;  %v723_v34 = vld [vmem:[%s1502_s13] sm:$0xff] }
 0x150   : > { %1204 = vrot.lane.b32.xlu1 %v1203_v38, %s1329_s0  ;;  %v1193_v57 = vpack.i.bf16 %v520_v16, %v519_v53  ;;  %v1198_v51 = vpack.i.bf16 %v554_v17, %v553_v15 }
 0x152   : > { %1194 = vrot.lane.b32.xlu0 %v1193_v57, %s1330_s4 }
 0x154   : > { %744 = vrot.lane.b32.xlu1 %v1035_v52, %s1330_s4 }
 0x156   : > { %1199 = vrot.lane.b32.xlu0 %v1198_v51, %s1331_s19 }
 0x158   : > { %748 = vrot.lane.b32.xlu1 %v1037_v10, %s1330_s4 }
 0x15a   : > { %746 = vrot.lane.b32.xlu0 %v1036_v5, %s1330_s4 }
 0x15c   : > { %790 = vrot.lane.b32.xlu1 %v1043_v27, %s1331_s19 }
 0x15e   : > { %750 = vrot.lane.b32.xlu0 %v1038_v18, %s1330_s4 }
 0x160   : > { %794 = vrot.lane.b32.xlu1 %v1045_v20, %s1331_s19 }
 0x162   : > { %792 = vrot.lane.b32.xlu0 %v1044_v19, %s1331_s19 }
 0x164   : > { %836 = vrot.lane.b32.xlu1 %v1051_v22, %s1329_s0 }
 0x166   : > { %796 = vrot.lane.b32.xlu0 %v1046_v21, %s1331_s19 }
 0x168   : > { %840 = vrot.lane.b32.xlu1 %v1053_v29, %s1329_s0 }
 0x16a   : > { %838 = vrot.lane.b32.xlu0 %v1052_v28, %s1329_s0 }
 0x16e   : > { %842 = vrot.lane.b32.xlu0 %v1054_v30, %s1329_s0 }
 0x1c2   : > { %v1205_v42 = vpop.permute.xlu1 %1204 }
 0x1c3   : > { %v1207_v45 = vunpack.i.h.bf16 %v1205_v42  ;;  %v1206_v24 = vunpack.i.l.bf16 %v1205_v42 }
 0x1c4   : > { %v1195_v35 = vpop.permute.xlu0 %1194 }
 0x1c5   : > { %v1197_v40 = vunpack.i.h.bf16 %v1195_v35  ;;  %v1196_v41 = vunpack.i.l.bf16 %v1195_v35 }
 0x1c6   : > { %v745_v63 = vpop.permute.xlu1 %744 }
 0x1c7   : > { %v615_v25 = vsel %vm613_vm1, %v1647_v8, %v1197_v40  ;;  %v614_v26 = vsel %vm613_vm1, %v485_v12, %v1196_v41  ;;  %v725_v12 = vld [vmem:[%s1502_s13 + $0x10] sm:$0xff]  ;;  %s1065_s13 = sshll.u32 %s1386_s22, 11  ;;  %s874_s22 = scalar_lea.sflag [#allocation4], %s1496_s14 }
 0x1c8   : > { %v1200_v43 = vpop.permute.xlu0 %1199  ;;  %s1760_s25 = scalar_lea.hbm %s1815_s5, %s1065_s13 }
 0x1c9   : > { %v1202_v44 = vunpack.i.h.bf16 %v1200_v43  ;;  %v1201_v23 = vunpack.i.l.bf16 %v1200_v43 }
 0x1ca   : > { %v749_v1 = vpop.permute.xlu1 %748 }
 0x1cb   : > { %v617_v46 = vsel %vm616_vm2, %v614_v26, %v1201_v23  ;;  %v618_v47 = vsel %vm616_vm2, %v615_v25, %v1202_v44 }
 0x1cc   : > { %v620_v48 = vsel %vm619_vm3, %v617_v46, %v1206_v24  ;;  %v621_v49 = vsel %vm619_vm3, %v618_v47, %v1207_v45  ;;  %v747_v62 = vpop.permute.xlu0 %746 }
 0x1cd   : > { %v1122_v54 = vpack.c.bf16 %v621_v49, %v620_v48 }
 0x1ce   : > { %v791_v32 = vpop.permute.xlu1 %790 }
 0x1cf   : > { %1123 = vmatprep.subr.bf16.mxu1 %v1122_v54 }
 0x1d0   : > { %1125 = vmatpush3.bf16.msra.mxu1 %v1122_v54  ;;  %v751_v0 = vpop.permute.xlu0 %750 }
 0x1d2   : > { %v795_v6 = vpop.permute.xlu1 %794 }
 0x1d3   : > { %1113 = vmatmul.mubr.msk.f32.vlgmr.msra.gmra.mrb[4].mxu1 %vm291_vm0, %v623_v55 }
 0x1d4   : > { %1115 = vmatprep.mubr.msk.f32.mxu1 %vm291_vm0, %v624_v60  ;;  %v793_v31 = vpop.permute.xlu0 %792 }
 0x1d6   : > { %v837_v53 = vpop.permute.xlu1 %836 }
 0x1d7   : > { %1116 = vmatmul.mubr.msk.f32.gmra.mrb[6].mxu1 %vm291_vm0, %v625_v61 }
 0x1d8   : > { %v797_v3 = vpop.permute.xlu0 %796 }
 0x1da   : > { %v841_v52 = vpop.permute.xlu1 %840 }
 0x1dc   : > { %v839_v56 = vpop.permute.xlu0 %838 }
 0x1e0   : > { %v843_v39 = vpop.permute.xlu0 %842 }
 0x2a6   : > { %v1114_v2 = vpop.f32.mrb[4].mxu1 }
 0x2a7   : > { %v728_v4 = vadd.f32 %v1114_v2, %v724_v33  ;;  %v704_v7 = vpop.f32.mrb[5].mxu1  ;;  %v757_v8 = vadd.f32 %v1114_v2, %v747_v62  ;;  %v803_v14 = vadd.f32 %v1114_v2, %v793_v31  ;;  %v849_v15 = vadd.f32 %v1114_v2, %v839_v56 }
 0x2a8   : > { %v727_v9 = vadd.f32 %v723_v34, %v704_v7  ;;  %v756_v11 = vadd.f32 %v745_v63, %v704_v7  ;;  %v802_v59 = vadd.f32 %v791_v32, %v704_v7  ;;  %v848_v38 = vadd.f32 %v837_v53, %v704_v7 }
 0x2a9   : > { %732 = vst.msk [vmem:[%s1712_s11 + $0x8] sm:$0xff] %vm613_vm1, %v728_v4  ;;  %766 = vrot.lane.b32.xlu0 %v757_v8, %s1329_s0 }
 0x2aa   : > { %731 = vst.msk [vmem:[%s1712_s11] sm:$0xff] %vm613_vm1, %v727_v9  ;;  %764 = vrot.lane.b32.xlu1 %v756_v11, %s1329_s0  ;;  %v1117_v36 = vpop.f32.mrb[6].mxu1 }
 0x2ab   : > { %v730_v37 = vadd.f32 %v1117_v36, %v726_v50  ;;  %v714_v13 = vpop.f32.mrb[7].mxu1  ;;  %v759_v16 = vadd.f32 %v1117_v36, %v751_v0  ;;  %v805_v57 = vadd.f32 %v1117_v36, %v797_v3  ;;  %v851_v5 = vadd.f32 %v1117_v36, %v843_v39 }
 0x2ac   : > { %v729_v58 = vadd.f32 %v725_v12, %v714_v13  ;;  %v758_v17 = vadd.f32 %v749_v1, %v714_v13  ;;  %v804_v51 = vadd.f32 %v795_v6, %v714_v13  ;;  %v850_v10 = vadd.f32 %v841_v52, %v714_v13 }
 0x2ad   : > { %734 = vst.msk [vmem:[%s1712_s11 + $0x18] sm:$0xff] %vm613_vm1, %v730_v37  ;;  %812 = vrot.lane.b32.xlu0 %v803_v14, %s1331_s19 }
 0x2ae   : > { %733 = vst.msk [vmem:[%s1712_s11 + $0x10] sm:$0xff] %vm613_vm1, %v729_v58  ;;  %810 = vrot.lane.b32.xlu1 %v802_v59, %s1331_s19 }
 0x2b1   : > { %858 = vrot.lane.b32.xlu0 %v849_v15, %s1330_s4 }
 0x2b2   : > { %856 = vrot.lane.b32.xlu1 %v848_v38, %s1330_s4 }
 0x2b5   : > { %770 = vrot.lane.b32.xlu0 %v759_v16, %s1329_s0 }
 0x2b6   : > { %768 = vrot.lane.b32.xlu1 %v758_v17, %s1329_s0 }
 0x2b9   : > { %816 = vrot.lane.b32.xlu0 %v805_v57, %s1331_s19 }
 0x2ba   : > { %814 = vrot.lane.b32.xlu1 %v804_v51, %s1331_s19 }
 0x2bd   : > { %862 = vrot.lane.b32.xlu0 %v851_v5, %s1330_s4 }
 0x2be   : > { %860 = vrot.lane.b32.xlu1 %v850_v10, %s1330_s4 }
 0x31b   : > { %v767_v18 = vpop.permute.xlu0 %766 }
 0x31c   : > { %1040 = vst.msk [vmem:[%s1712_s11 + $0x28] sm:$0xff] %vm613_vm1, %v767_v18  ;;  %v765_v27 = vpop.permute.xlu1 %764 }
 0x31d   : > { %1039 = vst.msk [vmem:[%s1712_s11 + $0x20] sm:$0xff] %vm613_vm1, %v765_v27 }
 0x31f   : > { %v813_v19 = vpop.permute.xlu0 %812 }
 0x320   : > { %1048 = vst.msk [vmem:[%s1712_s11 + $0x48] sm:$0xff] %vm613_vm1, %v813_v19  ;;  %v811_v20 = vpop.permute.xlu1 %810 }
 0x321   : > { %1047 = vst.msk [vmem:[%s1712_s11 + $0x40] sm:$0xff] %vm613_vm1, %v811_v20 }
 0x323   : > { %v859_v21 = vpop.permute.xlu0 %858 }
 0x324   : > { %1056 = vst.msk [vmem:[%s1712_s11 + $0x68] sm:$0xff] %vm613_vm1, %v859_v21  ;;  %v857_v22 = vpop.permute.xlu1 %856 }
 0x325   : > { %1055 = vst.msk [vmem:[%s1712_s11 + $0x60] sm:$0xff] %vm613_vm1, %v857_v22 }
 0x327   : > { %v771_v28 = vpop.permute.xlu0 %770 }
 0x328   : > { %1042 = vst.msk [vmem:[%s1712_s11 + $0x38] sm:$0xff] %vm613_vm1, %v771_v28  ;;  %v769_v29 = vpop.permute.xlu1 %768 }
 0x329   : > { %1041 = vst.msk [vmem:[%s1712_s11 + $0x30] sm:$0xff] %vm613_vm1, %v769_v29 }
 0x32b   : > { %v817_v30 = vpop.permute.xlu0 %816 }
 0x32c   : > { %1050 = vst.msk [vmem:[%s1712_s11 + $0x58] sm:$0xff] %vm613_vm1, %v817_v30  ;;  %v815_v35 = vpop.permute.xlu1 %814 }
 0x32d   : > { %1049 = vst.msk [vmem:[%s1712_s11 + $0x50] sm:$0xff] %vm613_vm1, %v815_v35 }
 0x32f   : > { %v863_v40 = vpop.permute.xlu0 %862 }
 0x330   : > { %1058 = vst.msk [vmem:[%s1712_s11 + $0x78] sm:$0xff] %vm613_vm1, %v863_v40  ;;  %v861_v41 = vpop.permute.xlu1 %860 }
 0x331   : > { %1057 = vst.msk [vmem:[%s1712_s11 + $0x70] sm:$0xff] %vm613_vm1, %v861_v41 }
 0x332   : > { %1266 = shalt.err (!%p1263_p0)
}
 0x333   : > { %s1267_s29 = scalar_lea.hbm %s1760_s25, 2048  ;;  %s1271_s0 = scalar_lea.hbm %s1815_s5, 4096 }
 0x334   : > { %p1268_p2 = scmp.ne.s32.totalorder %s1760_s25, %s1267_s29  ;;  %p1272_p12 = scmp.lt.u32.totalorder %s1760_s25, %s1815_s5 }
 0x335   : > { %p1273_p6 = scmp.lt.u32.totalorder %s1271_s0, %s1267_s29  ;;  %p1275_p3 = scmp.lt.u32.totalorder %s1267_s29, %s1760_s25 }
 0x336   : > { %p1269_p7 = pnand %p1268_p2, %p1851_p8 }
 0x337   : > { %p1274_p13 = por %p1273_p6, %p1272_p12 }
 0x338   : > { %p1270_p5 = pneg %p1269_p7 }
 0x339   : > { %p1276_p9 = por %p1275_p3, %p1274_p13 }
 0x33b   : > { %p1277_p10 = pnand %p1276_p9, %p1270_p5 }
 0x33d   : > { %1280 = shalt.err (!%p1277_p10)
}
 0x33e   : > { %s1333_s4 = smov 128   ;;  %s1334_s19 = smov 8  }
 0x33f   : > { %1135 = dma.vmem_to_hbm [thread:$0]  (%p1851_p8), %s1762_s10, 2048, %s1760_s25, %s874_s22, %s1333_s4, %s1333_s4, %s1334_s19  }
 0x340 PF: > { %s1852_s20 = sld [smem:[#allocation16_spill]]  ;;  %s1853_s21 = sld [smem:[#allocation13_spill]] }
 0x341   : > { %s902_s24 = sand.u32 1, %s1311_s18  }
 0x342   : > { %s903_s27 = scalar_lea.sflag [#allocation4], %s902_s24 }
 0x346   : > { %p1854_p1 = scmp.ne.s32.totalorder %s1852_s20, 0  ;;  %p1855_p4 = scmp.ge.s32.totalorder %s1853_s21, 2 }
 0x348   : > { %p1146_p11 = pnand %p1855_p4, %p1854_p1 }
 0x34a   : > { %1306 = dma.done.wait (!%p1146_p11), %s903_s27, 2048  }
 0x34b   : > { %1308 = vsyncadd (!%p1146_p11), %s903_s27, 4294965248  ;;  %s1856_s21 = sld [smem:[#allocation14_spill]]  ;;  %s1857_s18 = sld [smem:[#allocation11_spill]] }
 0x34c   : > { %s1858_s19 = sld [smem:[#allocation12_spill]]  ;;  %s1859_s20 = sld [smem:[#allocation15_spill]] }
 0x351   : > { %p19_p0 = scmp.ge.s32.totalorder %s1856_s21, 4  }
 0x353   :  { %21 = sbr.rel (!%p19_p0) target bundleno = 11 (0xb), region = 99 }
 0x35a   :  { %908 = vsyncpa [#allocation3], 1 }
 0x35b   :  { %910 = vsyncpa [#allocation3 + $0x1], 1 }
 0x35c   :  { %911 = vsyncpa [#allocation4], 1 }
 0x35d   :  { %913 = vsyncpa [#allocation4 + $0x1], 1 }
 0x35e   :  { %914 = vsyncpa [#allocation5], 1 }
 0x35f   :  { %916 = vsyncpa [#allocation5 + $0x1], 1 }

</bundles_post_ra>
